<compile_context>
chip_gen: v5e
topology: v5e:2x2
jax: 0.10.0
libtpu: 0.0.40
codegen_flags: <defaults>
</compile_context>

<pallas_src>
import functools

import jax
import jax.numpy as jnp
from jax.experimental import pallas as pl
from jax.experimental.pallas import tpu as pltpu

LOG_STD_MIN = -20.0
LOG_STD_MAX = 2.0


def actor_kernel(x_ref, w1_ref, w2_ref, wh_ref, b_ref, out_ref,
                 *, h1_dim, h2_dim, head_dim):
    cdt = w2_ref.dtype  # compute dtype fed to the 2nd/3rd MXU pass (f32 or bf16)

    # Packed f32 row: [ b1 | b2 | b_head | clamp_lo | clamp_hi ] (128-aligned).
    b1 = b_ref[:, pl.ds(0, h1_dim)]
    b2 = b_ref[:, pl.ds(h1_dim, h2_dim)]
    bh = b_ref[:, pl.ds(h1_dim + h2_dim, head_dim)]
    lo = b_ref[:, pl.ds(h1_dim + h2_dim + head_dim, head_dim)]
    hi = b_ref[:, pl.ds(h1_dim + h2_dim + 2 * head_dim, head_dim)]

    x = x_ref[...]  # f32 state tile

    # Hidden layer 1: Linear + ReLU (f32 weights, f32 accumulate).
    a1 = jnp.dot(x, w1_ref[...], preferred_element_type=jnp.float32) + b1
    a1 = jnp.maximum(a1, 0.0)

    # Hidden layer 2: Linear + ReLU (bf16 weights by default, f32 accumulate).
    a2 = jnp.dot(a1.astype(cdt), w2_ref[...],
                 preferred_element_type=jnp.float32) + b2
    a2 = jnp.maximum(a2, 0.0)

    # Fused heads: [ mean | log_std | pad ] in one matmul + one lane-dense store.
    y = jnp.dot(a2.astype(cdt), wh_ref[...],
                preferred_element_type=jnp.float32) + bh

    # Per-lane clamp: mean lanes have +-FLT_MAX bounds (no-op), log_std lanes
    # get [LOG_STD_MIN, LOG_STD_MAX].  Two VPU ops, no iota/select.
    y = jnp.minimum(jnp.maximum(y, lo), hi)

    out_ref[...] = y.astype(out_ref.dtype)


def pack_actor_params(p, out_dim, compute_dtype=jnp.bfloat16):
    """Fuse both heads into one 128-lane slab and pack biases + clamp bounds."""
    h1 = p["w1"].shape[1]
    h2 = p["w2"].shape[1]
    head_dim = 128 * pl.cdiv(2 * out_dim, 128)   # single lane-dense slab

    wh = jnp.zeros((h2, head_dim), jnp.float32)
    wh = wh.at[:, :out_dim].set(p["wm"])
    wh = wh.at[:, out_dim:2 * out_dim].set(p["ws"])

    bh = jnp.zeros((1, head_dim), jnp.float32)
    bh = bh.at[:, :out_dim].set(p["bm"])
    bh = bh.at[:, out_dim:2 * out_dim].set(p["bs"])

    big = float(jnp.finfo(jnp.float32).max)
    lo = jnp.full((1, head_dim), -big, jnp.float32)
    lo = lo.at[:, out_dim:2 * out_dim].set(LOG_STD_MIN)
    hi = jnp.full((1, head_dim), big, jnp.float32)
    hi = hi.at[:, out_dim:2 * out_dim].set(LOG_STD_MAX)

    # [1, h1 + h2 + 3*head_dim]
    bias = jnp.concatenate([p["b1"], p["b2"], bh, lo, hi], axis=1)

    return dict(
        w1=p["w1"].astype(jnp.float32),          # keep layer-1 weights f32 (tiny)
        w2=p["w2"].astype(compute_dtype),
        wh=wh.astype(compute_dtype),
        bias=bias.astype(jnp.float32),
        dims=(h1, h2, head_dim, out_dim),
    )


def actor_forward(state, packed, *, batch_tile=512):
    """Run the Actor forward pass as a single batch-tiled Pallas kernel."""
    h1, h2, head_dim, out_dim = packed["dims"]
    B, input_dim = state.shape

    # Sublane-align the batch, pick the tile, and keep >=2 grid steps so the
    # "parallel" batch axis can be sharded over both TensorCores on v7x.
    Bp = 8 * pl.cdiv(B, 8)
    TB = min(batch_tile, Bp)
    if Bp > 8 and TB >= Bp:
        TB = 8 * pl.cdiv(pl.cdiv(Bp, 2), 8)
    Bp = TB * pl.cdiv(Bp, TB)
    x = state if Bp == B else jnp.pad(state, ((0, Bp - B), (0, 0)))
    # NOTE: state stays f32; the cast for the bf16 matmuls happens in-kernel.

    bias_w = h1 + h2 + 3 * head_dim
    grid_n = Bp // TB

    flops = 2 * Bp * (input_dim * h1 + h1 * h2 + h2 * head_dim)
    bytes_accessed = (x.nbytes + packed["w1"].nbytes + packed["w2"].nbytes
                      + packed["wh"].nbytes + packed["bias"].nbytes
                      + Bp * head_dim * 4)

    kernel = functools.partial(
        actor_kernel, h1_dim=h1, h2_dim=h2, head_dim=head_dim)

    fused = pl.pallas_call(
        kernel,
        out_shape=jax.ShapeDtypeStruct((Bp, head_dim), jnp.float32),
        grid_spec=pltpu.PrefetchScalarGridSpec(
            num_scalar_prefetch=0,
            grid=(grid_n,),
            in_specs=[
                pl.BlockSpec((TB, input_dim), lambda i: (i, 0)),      # state tile
                pl.BlockSpec((input_dim, h1), lambda i: (0, 0)),      # W1 (resident)
                pl.BlockSpec((h1, h2), lambda i: (0, 0)),             # W2 (resident)
                pl.BlockSpec((h2, head_dim), lambda i: (0, 0)),       # fused head W
                pl.BlockSpec((1, bias_w), lambda i: (0, 0)),          # biases+bounds
            ],
            out_specs=pl.BlockSpec((TB, head_dim), lambda i: (i, 0)),
        ),
        compiler_params=pltpu.CompilerParams(
            dimension_semantics=("parallel",)),
        cost_estimate=pl.CostEstimate(
            flops=flops, transcendentals=0, bytes_accessed=bytes_accessed),
    )(x, packed["w1"], packed["w2"], packed["wh"], packed["bias"])

    mean = fused[:B, :out_dim]
    log_std = fused[:B, out_dim:2 * out_dim]
    return mean, log_std


def init_actor_params(key, input_dim, output_dim, hidden_dim=(256, 256)):
    """Deterministic synthetic init (PyTorch-Linear-style uniform bounds)."""
    ks = jax.random.split(key, 8)

    def linear(kw, kb, fan_in, fan_out):
        bound = 1.0 / jnp.sqrt(fan_in)
        w = jax.random.uniform(kw, (fan_in, fan_out), jnp.float32, -bound, bound)
        b = jax.random.uniform(kb, (1, fan_out), jnp.float32, -bound, bound)
        return w, b

    w1, b1 = linear(ks[0], ks[1], input_dim, hidden_dim[0])
    w2, b2 = linear(ks[2], ks[3], hidden_dim[0], hidden_dim[1])
    wm, bm = linear(ks[4], ks[5], hidden_dim[1], output_dim)
    ws, bs = linear(ks[6], ks[7], hidden_dim[1], output_dim)
    return dict(w1=w1, b1=b1, w2=w2, b2=b2, wm=wm, bm=bm, ws=ws, bs=bs)


def actor_forward_ref(state, p):
    """Pure-JAX reference for correctness checking."""
    h1 = jnp.maximum(state @ p["w1"] + p["b1"], 0.0)
    h2 = jnp.maximum(h1 @ p["w2"] + p["b2"], 0.0)
    mean = h2 @ p["wm"] + p["bm"]
    log_std = jnp.clip(h2 @ p["ws"] + p["bs"], LOG_STD_MIN, LOG_STD_MAX)
    return mean, log_std


# TODO(synk): Actor.sample (rsample + tanh squash + log_prob) is not part of
# forward(); it could be fused into the same kernel later using pltpu.prng_*.

if __name__ == "__main__":
    key = jax.random.PRNGKey(0)
    k_params, k_state1, k_state2 = jax.random.split(key, 3)

    input_dim = 16
    output_dim = 8
    hidden_dim = (256, 256)

    params = init_actor_params(k_params, input_dim, output_dim, hidden_dim)

    # --- Test 1: tiny batch, f32 weights (strict tolerance) ---
    state = jax.random.normal(k_state1, (8, input_dim), jnp.float32)
    packed_f32 = pack_actor_params(params, output_dim, compute_dtype=jnp.float32)
    mean, log_std = actor_forward(state, packed_f32)
    jax.block_until_ready((mean, log_std))
    mean_ref, log_std_ref = actor_forward_ref(state, params)
    assert mean.shape == (8, output_dim)
    assert log_std.shape == (8, output_dim)
    assert jnp.allclose(mean, mean_ref, atol=1e-5, rtol=1e-5)
    assert jnp.allclose(log_std, log_std_ref, atol=1e-5, rtol=1e-5)

    # --- Test 2: larger non-tile-aligned batch, bf16 weights / f32 accumulate ---
    state2 = jax.random.normal(k_state2, (200, input_dim), jnp.float32)
    packed_bf16 = pack_actor_params(params, output_dim, compute_dtype=jnp.bfloat16)
    mean2, log_std2 = actor_forward(state2, packed_bf16, batch_tile=512)
    jax.block_until_ready((mean2, log_std2))
    mean2_ref, log_std2_ref = actor_forward_ref(state2, params)
    assert mean2.shape == (200, output_dim)
    assert log_std2.shape == (200, output_dim)
    assert jnp.allclose(mean2, mean2_ref, atol=3e-2, rtol=3e-2)
    assert jnp.allclose(log_std2, log_std2_ref, atol=3e-2, rtol=3e-2)

    print("KERNEL_OK")
</pallas_src>

<mosaic_0001>
module attributes {stable_mosaic.version = 11 : i64} {
  func.func @actor_kernel(%arg0: i32, %arg1: memref<8x16xf32, #tpu.memory_space<vmem>>, %arg2: memref<16x256xf32, #tpu.memory_space<vmem>>, %arg3: memref<256x256xf32, #tpu.memory_space<vmem>>, %arg4: memref<256x128xf32, #tpu.memory_space<vmem>>, %arg5: memref<1x896xf32, #tpu.memory_space<vmem>>, %arg6: memref<8x128xf32, #tpu.memory_space<vmem>>) attributes {dimension_semantics = [#tpu.dimension_semantics<parallel>], iteration_bounds = array<i64: 1>, scalar_prefetch = 0 : i64, scratch_operands = 0 : i64, tpu.core_type = #tpu.core_type<tc>, window_params = [{transform_indices = @transform_0, window_bounds = array<i64: 8, 16>}, {pipeline_mode = #tpu.pipeline_mode<synchronous>, transform_indices = @transform_1, window_bounds = array<i64: 16, 256>}, {pipeline_mode = #tpu.pipeline_mode<synchronous>, transform_indices = @transform_2, window_bounds = array<i64: 256, 256>}, {pipeline_mode = #tpu.pipeline_mode<synchronous>, transform_indices = @transform_3, window_bounds = array<i64: 256, 128>}, {pipeline_mode = #tpu.pipeline_mode<synchronous>, transform_indices = @transform_4, window_bounds = array<i64: 1, 896>}, {transform_indices = @transform_5, window_bounds = array<i64: 8, 128>}]} {
    %c0 = arith.constant 0 : index
    %c0_0 = arith.constant 0 : index
    %0 = vector.load %arg5[%c0, %c0_0] : memref<1x896xf32, #tpu.memory_space<vmem>>, vector<1x256xf32>
    %c0_1 = arith.constant 0 : index
    %c256 = arith.constant 256 : index
    %1 = vector.load %arg5[%c0_1, %c256] : memref<1x896xf32, #tpu.memory_space<vmem>>, vector<1x256xf32>
    %c0_2 = arith.constant 0 : index
    %c512 = arith.constant 512 : index
    %2 = vector.load %arg5[%c0_2, %c512] : memref<1x896xf32, #tpu.memory_space<vmem>>, vector<1x128xf32>
    %c0_3 = arith.constant 0 : index
    %c640 = arith.constant 640 : index
    %3 = vector.load %arg5[%c0_3, %c640] : memref<1x896xf32, #tpu.memory_space<vmem>>, vector<1x128xf32>
    %c0_4 = arith.constant 0 : index
    %c768 = arith.constant 768 : index
    %4 = vector.load %arg5[%c0_4, %c768] : memref<1x896xf32, #tpu.memory_space<vmem>>, vector<1x128xf32>
    %c0_5 = arith.constant 0 : index
    %c0_6 = arith.constant 0 : index
    %5 = vector.load %arg1[%c0_5, %c0_6] : memref<8x16xf32, #tpu.memory_space<vmem>>, vector<8x16xf32>
    %c0_7 = arith.constant 0 : index
    %c0_8 = arith.constant 0 : index
    %6 = vector.load %arg2[%c0_7, %c0_8] : memref<16x256xf32, #tpu.memory_space<vmem>>, vector<16x256xf32>
    %cst = arith.constant dense<0.000000e+00> : vector<8x256xf32>
    %7 = tpu.matmul %5, %6, %cst {dimension_numbers = #tpu.dot_dimension_numbers<[1], [0], [0], [1], [0, 0, 1, 1], [], []>} : vector<8x16xf32>, vector<16x256xf32>, vector<8x256xf32> -> vector<8x256xf32>
    %8 = vector.broadcast %0 : vector<1x256xf32> to vector<8x256xf32>
    %9 = arith.addf %7, %8 : vector<8x256xf32>
    %cst_9 = arith.constant 0.000000e+00 : f32
    %10 = vector.broadcast %cst_9 : f32 to vector<8x256xf32>
    %11 = arith.maximumf %9, %10 : vector<8x256xf32>
    %c0_10 = arith.constant 0 : index
    %c0_11 = arith.constant 0 : index
    %12 = vector.load %arg3[%c0_10, %c0_11] : memref<256x256xf32, #tpu.memory_space<vmem>>, vector<256x256xf32>
    %cst_12 = arith.constant dense<0.000000e+00> : vector<8x256xf32>
    %13 = tpu.matmul %11, %12, %cst_12 {dimension_numbers = #tpu.dot_dimension_numbers<[1], [0], [0], [1], [0, 0, 1, 1], [], []>} : vector<8x256xf32>, vector<256x256xf32>, vector<8x256xf32> -> vector<8x256xf32>
    %14 = vector.broadcast %1 : vector<1x256xf32> to vector<8x256xf32>
    %15 = arith.addf %13, %14 : vector<8x256xf32>
    %cst_13 = arith.constant 0.000000e+00 : f32
    %16 = vector.broadcast %cst_13 : f32 to vector<8x256xf32>
    %17 = arith.maximumf %15, %16 : vector<8x256xf32>
    %c0_14 = arith.constant 0 : index
    %c0_15 = arith.constant 0 : index
    %18 = vector.load %arg4[%c0_14, %c0_15] : memref<256x128xf32, #tpu.memory_space<vmem>>, vector<256x128xf32>
    %cst_16 = arith.constant dense<0.000000e+00> : vector<8x128xf32>
    %19 = tpu.matmul %17, %18, %cst_16 {dimension_numbers = #tpu.dot_dimension_numbers<[1], [0], [0], [1], [0, 0, 1, 1], [], []>} : vector<8x256xf32>, vector<256x128xf32>, vector<8x128xf32> -> vector<8x128xf32>
    %20 = vector.broadcast %2 : vector<1x128xf32> to vector<8x128xf32>
    %21 = arith.addf %19, %20 : vector<8x128xf32>
    %22 = vector.broadcast %3 : vector<1x128xf32> to vector<8x128xf32>
    %23 = arith.maximumf %21, %22 : vector<8x128xf32>
    %24 = vector.broadcast %4 : vector<1x128xf32> to vector<8x128xf32>
    %25 = arith.minimumf %23, %24 : vector<8x128xf32>
    %c0_17 = arith.constant 0 : index
    %c0_18 = arith.constant 0 : index
    %26 = vector.load %arg6[%c0_17, %c0_18] : memref<8x128xf32, #tpu.memory_space<vmem>>, vector<8x128xf32>
    tpu.vector_store %arg6[%c0_17, %c0_18], %25 {strides = array<i32>} : memref<8x128xf32, #tpu.memory_space<vmem>>, vector<8x128xf32>,
    return
  }
  func.func @transform_0(%arg0: i32) -> (i32, i32) {
    %c0_i32 = arith.constant 0 : i32
    %c0_i32_0 = arith.constant 0 : i32
    return %arg0, %c0_i32 : i32, i32
  }
  func.func @transform_1(%arg0: i32) -> (i32, i32) {
    %c0_i32 = arith.constant 0 : i32
    %c0_i32_0 = arith.constant 0 : i32
    %c0_i32_1 = arith.constant 0 : i32
    return %c0_i32, %c0_i32_0 : i32, i32
  }
  func.func @transform_2(%arg0: i32) -> (i32, i32) {
    %c0_i32 = arith.constant 0 : i32
    %c0_i32_0 = arith.constant 0 : i32
    %c0_i32_1 = arith.constant 0 : i32
    return %c0_i32, %c0_i32_0 : i32, i32
  }
  func.func @transform_3(%arg0: i32) -> (i32, i32) {
    %c0_i32 = arith.constant 0 : i32
    %c0_i32_0 = arith.constant 0 : i32
    %c0_i32_1 = arith.constant 0 : i32
    return %c0_i32, %c0_i32_0 : i32, i32
  }
  func.func @transform_4(%arg0: i32) -> (i32, i32) {
    %c0_i32 = arith.constant 0 : i32
    %c0_i32_0 = arith.constant 0 : i32
    %c0_i32_1 = arith.constant 0 : i32
    return %c0_i32, %c0_i32_0 : i32, i32
  }
  func.func @transform_5(%arg0: i32) -> (i32, i32) {
    %c0_i32 = arith.constant 0 : i32
    %c0_i32_0 = arith.constant 0 : i32
    return %arg0, %c0_i32 : i32, i32
  }
}

</mosaic_0001>

<bundles_post_ra>
// kernel: tpu_custom_call.1
= control target key start
LH: loop header
LB: loop body
LE: loop exit
PB: predicated region body
PF: predicated region fallthrough
CT: control target
= control target key end

     0   :  { %10 = vsyncpa [#allocation3], 0  ;;  %s635_s0 = inlined_call_operand.hbm [shape: f32[8,16], index: 0, kind: input, shape index: {}]   ;;  %s636_s1 = inlined_call_operand.hbm [shape: f32[16,256], index: 1, kind: input, shape index: {}]   ;;  %s637_s2 = inlined_call_operand.hbm [shape: f32[256,256], index: 2, kind: input, shape index: {}]   ;;  %s638_s3 = inlined_call_operand.hbm [shape: f32[256,128], index: 3, kind: input, shape index: {}]   ;;  %s639_s4 = inlined_call_operand.hbm [shape: f32[1,896], index: 4, kind: input, shape index: {}]   ;;  %s640_s5 = inlined_call_operand.hbm [shape: f32[8,128], index: 5, kind: output, shape index: {}]  }
   0x1   :  { %11 = vsyncpa [#allocation6], 0 }
   0x2   :  { %12 = vsyncpa [#allocation9], 0  ;;  %s29_s20 = sshll.u32 %s636_s1, 4  ;;  %s30_s20 = int_to_ptr.hbm [resolvable:$true] %s29_s20 }
   0x3   :  { %13 = vsyncpa [#allocation4], 0  ;;  %s577_s21 = smov [#allocation5]   ;;  %s55_s25 = sshll.u32 %s638_s3, 4  ;;  %s56_s25 = int_to_ptr.hbm [resolvable:$true] %s55_s25 }
   0x4   :  { %s31_s22 = sshll.u32 %s577_s21, 4  ;;  %s578_s26 = smov 256   ;;  %s32_s22 = int_to_ptr.vmem [resolvable:$true] %s31_s22 }
   0x5   :  { %s579_s27 = smov 16   ;;  %s580_s28 = smov [#allocation8]  }
   0x6   :  { %37 = dma.hbm_to_vmem [thread:$0]  %s30_s20, 512, %s32_s22, [#allocation6], %s578_s26, %s578_s26, %s579_s27  }
   0x7   :  { %s57_s29 = sshll.u32 %s580_s28, 4  ;;  %s581_s30 = smov 128   ;;  %s58_s29 = int_to_ptr.vmem [resolvable:$true] %s57_s29 }
   0x8   :  { %s582_s6 = smov 8   ;;  %s19_s8 = sshll.u32 %s635_s0, 4  ;;  %s20_s8 = int_to_ptr.hbm [resolvable:$true] %s19_s8 }
   0x9   :  { %63 = dma.hbm_to_vmem [thread:$0]  %s56_s25, 4096, %s58_s29, [#allocation9], %s581_s30, %s581_s30, %s582_s6  }
   0xa   :  { %s583_s9 = smov [#allocation2]   ;;  %s42_s12 = sshll.u32 %s637_s2, 4  ;;  %s43_s12 = int_to_ptr.hbm [resolvable:$true] %s42_s12 }
   0xb   :  { %s21_s10 = sshll.u32 %s583_s9, 4  ;;  %s584_s13 = smov [#allocation7]   ;;  %s22_s10 = int_to_ptr.vmem [resolvable:$true] %s21_s10 }
   0xc   :  { %24 = dma.hbm_to_vmem [thread:$0]  %s20_s8, 128, %s22_s10, [#allocation3]  }
   0xd   :  { %s44_s14 = sshll.u32 %s584_s13, 4  ;;  %s69_s17 = sshll.u32 %s639_s4, 4  ;;  %s45_s14 = int_to_ptr.vmem [resolvable:$true] %s44_s14  ;;  %s70_s17 = int_to_ptr.hbm [resolvable:$true] %s69_s17 }
   0xe   :  { %50 = dma.hbm_to_vmem [thread:$0]  %s43_s12, 8192, %s45_s14, [#allocation6], %s578_s26, %s578_s26, %s579_s27  }
   0xf   :  { %s585_s0 = smov [#allocation10]  }
  0x10   :  { %s71_s18 = sshll.u32 %s585_s0, 4  ;;  %s72_s18 = int_to_ptr.vmem [resolvable:$true] %s71_s18 }
  0x11   :  { %74 = dma.hbm_to_vmem [thread:$0]  %s70_s17, 112, %s72_s18, [#allocation9]  }
  0x12   :  { %569 = dma.done.wait [#allocation3], 128  }
  0x13   :  { %570 = vsyncadd [#allocation3], 4294967168 }
  0x14   :  { %571 = dma.done.wait [#allocation6], 8704  }
  0x15   :  { %572 = vsyncadd [#allocation6], 4294958592 }
  0x16   :  { %573 = dma.done.wait [#allocation9], 4208  }
  0x17   :  { %574 = vsyncadd [#allocation9], 4294963088  ;;  %v103_v0 = vld [vmem:[#allocation5 + $0x10] sm:$0xff]  ;;  %v101_v1 = vld [vmem:[#allocation5] sm:$0xff]  ;;  %vm110_vm0 = vcmask 130048   ;;  %s586_s2 = smov [#allocation11]  }
  0x18   :  { %v104_v2 = vld [vmem:[#allocation5 + $0x18] sm:$0xff]  ;;  %128 = vmatpush.msra.mxu0 %v103_v0  ;;  %v102_v4 = vld [vmem:[#allocation5 + $0x8] sm:$0xff]  ;;  %v186_v5 = vld [vmem:[#allocation7 + $0xf0] sm:$0xff]  ;;  %s396_s4 = sshll.u32 %s586_s2, 4  ;;  %s398_s21 = sshll.u32 %s640_s5, 4  ;;  %s397_s4 = int_to_ptr.vmem [resolvable:$true] %s396_s4  ;;  %s399_s21 = int_to_ptr.hbm [resolvable:$true] %s398_s21 }
  0x19   :  { %148 = vmatpush.msra.mxu1 %v104_v2  ;;  %v100_v3 = vld [vmem:[#allocation2] sm:$0xff]  ;;  %225 = vmatpush.msra.mxu2 %v186_v5  ;;  %v184_v7 = vld [vmem:[#allocation7 + $0xe0] sm:$0xff]  ;;  %v218_v8 = vld [vmem:[#allocation7 + $0x1f0] sm:$0xff] }
  0x1a   :  { %v187_v6 = vld [vmem:[#allocation7 + $0xf8] sm:$0xff]  ;;  %129 = vmatpush.msra.mxu0 %v101_v1  ;;  %v185_v10 = vld [vmem:[#allocation7 + $0xe8] sm:$0xff]  ;;  %v182_v11 = vld [vmem:[#allocation7 + $0xd0] sm:$0xff]  ;;  %245 = vmatpush.msra.mxu3 %v218_v8 }
  0x1b   :  { %149 = vmatpush.msra.mxu1 %v102_v4  ;;  %v219_v9 = vld [vmem:[#allocation7 + $0x1f8] sm:$0xff]  ;;  %410 = vmatmul.msk.f32.vlgmr.msra.gmra.mxu0 %vm110_vm0, %v100_v3  ;;  %v216_v12 = vld [vmem:[#allocation7 + $0x1e0] sm:$0xff]  ;;  %v217_v13 = vld [vmem:[#allocation7 + $0x1e8] sm:$0xff] }
  0x1c   :  { %411 = vmatmul.msk.f32.vlgmr.msra.gmra.mxu1 %vm110_vm0, %v100_v3  ;;  %265 = vmatpush.msrb.mxu0 %v187_v6  ;;  %v183_v14 = vld [vmem:[#allocation7 + $0xd8] sm:$0xff]  ;;  %v180_v15 = vld [vmem:[#allocation7 + $0xc0] sm:$0xff]  ;;  %v214_v16 = vld [vmem:[#allocation7 + $0x1d0] sm:$0xff] }
  0x1d   :  { %226 = vmatpush.msra.mxu2 %v184_v7  ;;  %285 = vmatpush.msrb.mxu1 %v219_v9  ;;  %v215_v17 = vld [vmem:[#allocation7 + $0x1d8] sm:$0xff]  ;;  %v181_v18 = vld [vmem:[#allocation7 + $0xc8] sm:$0xff]  ;;  %v178_v19 = vld [vmem:[#allocation7 + $0xb0] sm:$0xff] }
  0x1e   :  { %266 = vmatpush.msrb.mxu0 %v185_v10  ;;  %246 = vmatpush.msra.mxu3 %v216_v12  ;;  %v212_v20 = vld [vmem:[#allocation7 + $0x1c0] sm:$0xff]  ;;  %v213_v21 = vld [vmem:[#allocation7 + $0x1c8] sm:$0xff]  ;;  %v179_v22 = vld [vmem:[#allocation7 + $0xb8] sm:$0xff] }
  0x1f   :  { %227 = vmatpush.msra.mxu2 %v182_v11  ;;  %286 = vmatpush.msrb.mxu1 %v217_v13  ;;  %v176_v23 = vld [vmem:[#allocation7 + $0xa0] sm:$0xff]  ;;  %v210_v24 = vld [vmem:[#allocation7 + $0x1b0] sm:$0xff]  ;;  %v211_v25 = vld [vmem:[#allocation7 + $0x1b8] sm:$0xff] }
  0x20   :  { %267 = vmatpush.msrb.mxu0 %v183_v14  ;;  %247 = vmatpush.msra.mxu3 %v214_v16  ;;  %v177_v26 = vld [vmem:[#allocation7 + $0xa8] sm:$0xff]  ;;  %v174_v27 = vld [vmem:[#allocation7 + $0x90] sm:$0xff]  ;;  %v208_v28 = vld [vmem:[#allocation7 + $0x1a0] sm:$0xff] }
  0x21   :  { %228 = vmatpush.msra.mxu2 %v180_v15  ;;  %287 = vmatpush.msrb.mxu1 %v215_v17  ;;  %v209_v29 = vld [vmem:[#allocation7 + $0x1a8] sm:$0xff]  ;;  %v175_v30 = vld [vmem:[#allocation7 + $0x98] sm:$0xff]  ;;  %v172_v31 = vld [vmem:[#allocation7 + $0x80] sm:$0xff] }
  0x22   :  { %268 = vmatpush.msrb.mxu0 %v181_v18  ;;  %248 = vmatpush.msra.mxu3 %v212_v20  ;;  %v206_v32 = vld [vmem:[#allocation7 + $0x190] sm:$0xff]  ;;  %v207_v33 = vld [vmem:[#allocation7 + $0x198] sm:$0xff]  ;;  %v173_v34 = vld [vmem:[#allocation7 + $0x88] sm:$0xff] }
  0x23   :  { %229 = vmatpush.msra.mxu2 %v178_v19  ;;  %288 = vmatpush.msrb.mxu1 %v213_v21  ;;  %v170_v35 = vld [vmem:[#allocation7 + $0x70] sm:$0xff]  ;;  %v204_v36 = vld [vmem:[#allocation7 + $0x180] sm:$0xff]  ;;  %v171_v37 = vld [vmem:[#allocation7 + $0x78] sm:$0xff] }
  0x24   :  { %269 = vmatpush.msrb.mxu0 %v179_v22  ;;  %249 = vmatpush.msra.mxu3 %v210_v24  ;;  %v205_v38 = vld [vmem:[#allocation7 + $0x188] sm:$0xff]  ;;  %v168_v39 = vld [vmem:[#allocation7 + $0x60] sm:$0xff]  ;;  %v202_v40 = vld [vmem:[#allocation7 + $0x170] sm:$0xff] }
  0x25   :  { %230 = vmatpush.msra.mxu2 %v176_v23  ;;  %289 = vmatpush.msrb.mxu1 %v211_v25  ;;  %v203_v41 = vld [vmem:[#allocation7 + $0x178] sm:$0xff]  ;;  %v169_v42 = vld [vmem:[#allocation7 + $0x68] sm:$0xff]  ;;  %v166_v43 = vld [vmem:[#allocation7 + $0x50] sm:$0xff] }
  0x26   :  { %270 = vmatpush.msrb.mxu0 %v177_v26  ;;  %250 = vmatpush.msra.mxu3 %v208_v28  ;;  %v200_v44 = vld [vmem:[#allocation7 + $0x160] sm:$0xff]  ;;  %v201_v45 = vld [vmem:[#allocation7 + $0x168] sm:$0xff]  ;;  %v167_v46 = vld [vmem:[#allocation7 + $0x58] sm:$0xff] }
  0x27   :  { %231 = vmatpush.msra.mxu2 %v174_v27  ;;  %290 = vmatpush.msrb.mxu1 %v209_v29  ;;  %v164_v47 = vld [vmem:[#allocation7 + $0x40] sm:$0xff]  ;;  %v198_v48 = vld [vmem:[#allocation7 + $0x150] sm:$0xff]  ;;  %v199_v49 = vld [vmem:[#allocation7 + $0x158] sm:$0xff] }
  0x28   :  { %271 = vmatpush.msrb.mxu0 %v175_v30  ;;  %251 = vmatpush.msra.mxu3 %v206_v32  ;;  %v165_v50 = vld [vmem:[#allocation7 + $0x48] sm:$0xff]  ;;  %v162_v51 = vld [vmem:[#allocation7 + $0x30] sm:$0xff]  ;;  %v196_v52 = vld [vmem:[#allocation7 + $0x140] sm:$0xff] }
  0x29   :  { %232 = vmatpush.msra.mxu2 %v172_v31  ;;  %291 = vmatpush.msrb.mxu1 %v207_v33  ;;  %v197_v53 = vld [vmem:[#allocation7 + $0x148] sm:$0xff]  ;;  %v163_v54 = vld [vmem:[#allocation7 + $0x38] sm:$0xff]  ;;  %v160_v55 = vld [vmem:[#allocation7 + $0x20] sm:$0xff] }
  0x2a   :  { %272 = vmatpush.msrb.mxu0 %v173_v34  ;;  %252 = vmatpush.msra.mxu3 %v204_v36  ;;  %v194_v56 = vld [vmem:[#allocation7 + $0x130] sm:$0xff]  ;;  %v161_v57 = vld [vmem:[#allocation7 + $0x28] sm:$0xff]  ;;  %v195_v58 = vld [vmem:[#allocation7 + $0x138] sm:$0xff] }
  0x2b   :  { %233 = vmatpush.msra.mxu2 %v170_v35  ;;  %292 = vmatpush.msrb.mxu1 %v205_v38  ;;  %v158_v59 = vld [vmem:[#allocation7 + $0x10] sm:$0xff]  ;;  %v192_v60 = vld [vmem:[#allocation7 + $0x120] sm:$0xff]  ;;  %v159_v61 = vld [vmem:[#allocation7 + $0x18] sm:$0xff] }
  0x2c   :  { %273 = vmatpush.msrb.mxu0 %v171_v37  ;;  %253 = vmatpush.msra.mxu3 %v202_v40  ;;  %v193_v62 = vld [vmem:[#allocation7 + $0x128] sm:$0xff]  ;;  %v156_v63 = vld [vmem:[#allocation7] sm:$0xff]  ;;  %v190_v0 = vld [vmem:[#allocation7 + $0x110] sm:$0xff] }
  0x2d   :  { %234 = vmatpush.msra.mxu2 %v168_v39  ;;  %293 = vmatpush.msrb.mxu1 %v203_v41  ;;  %v157_v1 = vld [vmem:[#allocation7 + $0x8] sm:$0xff]  ;;  %v191_v2 = vld [vmem:[#allocation7 + $0x118] sm:$0xff]  ;;  %v188_v3 = vld [vmem:[#allocation7 + $0x100] sm:$0xff] }
  0x2e   :  { %274 = vmatpush.msrb.mxu0 %v169_v42  ;;  %254 = vmatpush.msra.mxu3 %v200_v44  ;;  %v189_v4 = vld [vmem:[#allocation7 + $0x108] sm:$0xff]  ;;  %v338_v5 = vld [vmem:[#allocation8 + $0xf8] sm:$0xff]  ;;  %v337_v6 = vld [vmem:[#allocation8 + $0xf0] sm:$0xff] }
  0x2f   :  { %235 = vmatpush.msra.mxu2 %v166_v43  ;;  %294 = vmatpush.msrb.mxu1 %v201_v45  ;;  %v322_v7 = vld [vmem:[#allocation8 + $0x78] sm:$0xff]  ;;  %v321_v8 = vld [vmem:[#allocation8 + $0x70] sm:$0xff]  ;;  %v336_v9 = vld [vmem:[#allocation8 + $0xe8] sm:$0xff] }
  0x30   :  { %275 = vmatpush.msrb.mxu0 %v167_v46  ;;  %255 = vmatpush.msra.mxu3 %v198_v48  ;;  %v320_v10 = vld [vmem:[#allocation8 + $0x68] sm:$0xff]  ;;  %v335_v11 = vld [vmem:[#allocation8 + $0xe0] sm:$0xff]  ;;  %v334_v13 = vld [vmem:[#allocation8 + $0xd8] sm:$0xff] }
  0x31   :  { %236 = vmatpush.msra.mxu2 %v164_v47  ;;  %295 = vmatpush.msrb.mxu1 %v199_v49  ;;  %v319_v12 = vld [vmem:[#allocation8 + $0x60] sm:$0xff]  ;;  %v318_v14 = vld [vmem:[#allocation8 + $0x58] sm:$0xff]  ;;  %v333_v15 = vld [vmem:[#allocation8 + $0xd0] sm:$0xff] }
  0x32   :  { %276 = vmatpush.msrb.mxu0 %v165_v50  ;;  %256 = vmatpush.msra.mxu3 %v196_v52  ;;  %v317_v16 = vld [vmem:[#allocation8 + $0x50] sm:$0xff]  ;;  %v332_v17 = vld [vmem:[#allocation8 + $0xc8] sm:$0xff]  ;;  %v331_v19 = vld [vmem:[#allocation8 + $0xc0] sm:$0xff] }
  0x33   :  { %237 = vmatpush.msra.mxu2 %v162_v51  ;;  %296 = vmatpush.msrb.mxu1 %v197_v53  ;;  %v316_v18 = vld [vmem:[#allocation8 + $0x48] sm:$0xff]  ;;  %v315_v20 = vld [vmem:[#allocation8 + $0x40] sm:$0xff]  ;;  %v330_v21 = vld [vmem:[#allocation8 + $0xb8] sm:$0xff] }
  0x34   :  { %277 = vmatpush.msrb.mxu0 %v163_v54  ;;  %257 = vmatpush.msra.mxu3 %v194_v56  ;;  %v314_v22 = vld [vmem:[#allocation8 + $0x38] sm:$0xff]  ;;  %v329_v23 = vld [vmem:[#allocation8 + $0xb0] sm:$0xff]  ;;  %v328_v24 = vld [vmem:[#allocation8 + $0xa8] sm:$0xff] }
  0x35   :  { %238 = vmatpush.msra.mxu2 %v160_v55  ;;  %297 = vmatpush.msrb.mxu1 %v195_v58  ;;  %v95_v25 = vld [vmem:[#allocation10] sm:$0x3]  ;;  %v313_v35 = vld [vmem:[#allocation8 + $0x30] sm:$0xff]  ;;  %v326_v36 = vld [vmem:[#allocation8 + $0x98] sm:$0xff] }
  0x36   :  { %278 = vmatpush.msrb.mxu0 %v161_v57  ;;  %258 = vmatpush.msra.mxu3 %v192_v60  ;;  %v327_v26 = vld [vmem:[#allocation8 + $0xa0] sm:$0xff]  ;;  %v106_v27 = vperm.slane %v95_v25, 0  ;;  %v107_v28 = vperm.slane %v95_v25, 1  ;;  %v312_v37 = vld [vmem:[#allocation8 + $0x28] sm:$0xff]  ;;  %v325_v38 = vld [vmem:[#allocation8 + $0x90] sm:$0xff] }
  0x37   :  { %239 = vmatpush.msra.mxu2 %v158_v59  ;;  %298 = vmatpush.msrb.mxu1 %v193_v62  ;;  %v311_v39 = vld [vmem:[#allocation8 + $0x20] sm:$0xff]  ;;  %v324_v40 = vld [vmem:[#allocation8 + $0x88] sm:$0xff]  ;;  %v310_v41 = vld [vmem:[#allocation8 + $0x18] sm:$0xff] }
  0x38   :  { %279 = vmatpush.msrb.mxu0 %v159_v61  ;;  %259 = vmatpush.msra.mxu3 %v190_v0  ;;  %v323_v42 = vld [vmem:[#allocation8 + $0x80] sm:$0xff]  ;;  %v309_v43 = vld [vmem:[#allocation8 + $0x10] sm:$0xff]  ;;  %v308_v44 = vld [vmem:[#allocation8 + $0x8] sm:$0xff] }
  0x39   :  { %240 = vmatpush.msra.mxu2 %v156_v63  ;;  %299 = vmatpush.msrb.mxu1 %v191_v2  ;;  %v307_v45 = vld [vmem:[#allocation8] sm:$0xff] }
  0x3a   :  { %280 = vmatpush.msrb.mxu0 %v157_v1  ;;  %260 = vmatpush.msra.mxu3 %v188_v3  ;;  %v96_v46 = vld [vmem:[#allocation10 + $0x2] sm:$0x3]  ;;  %v422_v59 = vld [vmem:[#allocation10 + $0x4] ss:$0 sm:$0xff]  ;;  %v423_v62 = vld [vmem:[#allocation10 + $0x5] ss:$0 sm:$0xff] }
  0x3b   :  { %300 = vmatpush.msrb.mxu1 %v189_v4  ;;  %342 = vmatpush.msrb.mxu2 %v322_v7  ;;  %v222_v47 = vperm.slane %v96_v46, 1  ;;  %v221_v52 = vperm.slane %v96_v46, 0  ;;  %v424_v1 = vld [vmem:[#allocation10 + $0x6] ss:$0 sm:$0xff] }
  0x3c   :  { %362 = vmatpush.msrb.mxu3 %v338_v5 }
  0x3d   :  { %343 = vmatpush.msrb.mxu2 %v321_v8 }
  0x3e   :  { %363 = vmatpush.msrb.mxu3 %v337_v6 }
  0x3f   :  { %344 = vmatpush.msrb.mxu2 %v320_v10 }
  0x40   :  { %364 = vmatpush.msrb.mxu3 %v336_v9 }
  0x41   :  { %345 = vmatpush.msrb.mxu2 %v319_v12 }
  0x42   :  { %365 = vmatpush.msrb.mxu3 %v335_v11 }
  0x43   :  { %346 = vmatpush.msrb.mxu2 %v318_v14 }
  0x44   :  { %366 = vmatpush.msrb.mxu3 %v334_v13 }
  0x45   :  { %347 = vmatpush.msrb.mxu2 %v317_v16 }
  0x46   :  { %367 = vmatpush.msrb.mxu3 %v333_v15 }
  0x47   :  { %348 = vmatpush.msrb.mxu2 %v316_v18 }
  0x48   :  { %368 = vmatpush.msrb.mxu3 %v332_v17 }
  0x49   :  { %349 = vmatpush.msrb.mxu2 %v315_v20 }
  0x4a   :  { %369 = vmatpush.msrb.mxu3 %v331_v19 }
  0x4b   :  { %350 = vmatpush.msrb.mxu2 %v314_v22 }
  0x4c   :  { %370 = vmatpush.msrb.mxu3 %v330_v21 }
  0x4d   :  { %351 = vmatpush.msrb.mxu2 %v313_v35 }
  0x4e   :  { %371 = vmatpush.msrb.mxu3 %v329_v23 }
  0x4f   :  { %352 = vmatpush.msrb.mxu2 %v312_v37 }
  0x50   :  { %372 = vmatpush.msrb.mxu3 %v328_v24 }
  0x51   :  { %353 = vmatpush.msrb.mxu2 %v311_v39 }
  0x52   :  { %373 = vmatpush.msrb.mxu3 %v327_v26 }
  0x53   :  { %354 = vmatpush.msrb.mxu2 %v310_v41 }
  0x54   :  { %374 = vmatpush.msrb.mxu3 %v326_v36 }
  0x55   :  { %355 = vmatpush.msrb.mxu2 %v309_v43 }
  0x56   :  { %375 = vmatpush.msrb.mxu3 %v325_v38 }
  0x57   :  { %356 = vmatpush.msrb.mxu2 %v308_v44 }
  0x58   :  { %376 = vmatpush.msrb.mxu3 %v324_v40 }
  0x59   :  { %357 = vmatpush.msrb.mxu2 %v307_v45 }
  0x5a   :  { %377 = vmatpush.msrb.mxu3 %v323_v42 }
  0x98   :  { %v131_v29 = vpop.f32.mrf.mxu0 }
  0x99   :  { %v151_v30 = vpop.f32.mrf.mxu1  ;;  %v132_v31 = vadd.f32 %v131_v29, %v106_v27 }
  0x9a   :  { %v152_v32 = vadd.f32 %v151_v30, %v107_v28 }
  0x9b   :  { %v154_v33 = vmax.f32 %v132_v31, 0.0 }
  0x9c   :  { %v155_v34 = vmax.f32 %v152_v32, 0.0 }
  0x9d   :  { %241 = vmatmul.f32.vlgmr.msra.gmra.mxu2 %v154_v33  ;;  %281 = vmatmul.f32.vlgmr.msrb.gmra.mxu0 %v154_v33 }
  0x9e   :  { %261 = vmatmul.f32.vlgmr.msra.gmra.mxu3 %v155_v34  ;;  %301 = vmatmul.f32.vlgmr.msrb.gmra.mxu1 %v155_v34 }
 0x11a   :  { %v282_v48 = vpop.f32.mrf.mxu0 }
 0x11b   :  { %v283_v49 = vadd.f32 %v282_v48, %v222_v47  ;;  %v302_v50 = vpop.f32.mrf.mxu1 }
 0x11d   :  { %v303_v51 = vadd.f32 %v302_v50, %v283_v49 }
 0x11f   :  { %v306_v53 = vmax.f32 %v303_v51, 0.0 }
 0x120   :  { %v242_v54 = vpop.f32.mrf.mxu2 }
 0x121   :  { %v243_v55 = vadd.f32 %v242_v54, %v221_v52  ;;  %378 = vmatmul.f32.vlgmr.msrb.gmra.mxu3 %v306_v53  ;;  %v262_v56 = vpop.f32.mrf.mxu3 }
 0x123   :  { %v263_v57 = vadd.f32 %v262_v56, %v243_v55 }
 0x125   :  { %v305_v58 = vmax.f32 %v263_v57, 0.0 }
 0x127   :  { %358 = vmatmul.f32.vlgmr.msrb.gmra.mxu2 %v305_v58 }
 0x1a4   :  { %v379_v63 = vpop.f32.mrf.mxu3 }
 0x1aa   :  { %v359_v60 = vpop.f32.mrf.mxu2 }
 0x1ab   :  { %v360_v61 = vadd.f32 %v422_v59, %v359_v60 }
 0x1ad   :  { %v380_v0 = vadd.f32 %v379_v63, %v360_v61 }
 0x1af   :  { %v385_v2 = vmax.f32 %v380_v0, %v423_v62 }
 0x1b1   :  { %v389_v3 = vmin.f32 %v385_v2, %v424_v1 }
 0x1b3   :  { %390 = vst [vmem:[#allocation11] sm:$0xff] %v389_v3 }
 0x1b4   :  { %401 = dma.vmem_to_hbm [thread:$0]  %s397_s4, 128, %s399_s21, [#allocation4]  }
 0x1b5   :  { %575 = dma.done.wait [#allocation4], 128  }
 0x1b6   :  { %576 = vsyncadd [#allocation4], 4294967168 }
 0x1b7   :  { %406 = vsyncpa [#allocation3], 1 }
 0x1b8   :  { %407 = vsyncpa [#allocation6], 1 }
 0x1b9   :  { %408 = vsyncpa [#allocation9], 1 }
 0x1ba   :  { %409 = vsyncpa [#allocation4], 1 }

</bundles_post_ra>
